<compile_context>
chip_gen: v7x
topology: tpu7x:2x2x1
jax: 0.10.0
libtpu: 0.0.40
codegen_flags: <defaults>
</compile_context>

<pallas_src>
import jax
import jax.numpy as jnp
from jax import lax
from jax.experimental import pallas as pl
from jax.experimental.pallas import tpu as pltpu

BN_EPS = 1e-5


def g_fused_kernel(x_ref, w0_ref, bn0_ref, w1_ref, bn1_ref, o_ref):
    """One grid step = one lane-dense fc1 output tile.

    bn*_ref rows are [bias; gamma; beta].  BN statistics are per-feature over the
    full batch, so computing the full-batch hidden strip per step is exact.
    """
    B = x_ref.shape[0]
    inv_b = 1.0 / float(B)

    # ---- fc0 (bf16 MXU, f32 accumulate) + bias ----
    h = jnp.dot(x_ref[...], w0_ref[...], preferred_element_type=jnp.float32)
    h = h + bn0_ref[0:1, :]

    # ---- BN0 (training-mode batch stats, one pass) + ReLU ----
    mean0 = jnp.sum(h, axis=0, keepdims=True) * inv_b
    var0 = jnp.maximum(jnp.sum(h * h, axis=0, keepdims=True) * inv_b - mean0 * mean0, 0.0)
    h = bn0_ref[1:2, :] * (h - mean0) * lax.rsqrt(var0 + BN_EPS) + bn0_ref[2:3, :]
    h = jnp.maximum(h, 0.0)

    # ---- fc1 output tile (bf16 MXU, f32 accumulate) + bias ----
    h2 = jnp.dot(h.astype(jnp.bfloat16), w1_ref[...], preferred_element_type=jnp.float32)
    h2 = h2 + bn1_ref[0:1, :]

    # ---- BN1 + ReLU, lane-dense store ----
    mean1 = jnp.sum(h2, axis=0, keepdims=True) * inv_b
    var1 = jnp.maximum(jnp.sum(h2 * h2, axis=0, keepdims=True) * inv_b - mean1 * mean1, 0.0)
    h2 = bn1_ref[1:2, :] * (h2 - mean1) * lax.rsqrt(var1 + BN_EPS) + bn1_ref[2:3, :]
    o_ref[...] = jnp.maximum(h2, 0.0).astype(o_ref.dtype)


def _pad_axis(a, axis, target):
    pad = target - a.shape[axis]
    if pad == 0:
        return a
    widths = [(0, 0)] * a.ndim
    widths[axis] = (0, pad)
    return jnp.pad(a, widths)


def g_forward(z, y, params, num_class, *, tile_n=None):
    """Pallas forward for G. z: (B, latent) f32, y: (B, 1) int."""
    w0, b0, g0, be0, w1, b1, g1, be1 = params
    B, latent_dim = z.shape
    Kin = latent_dim + num_class
    F = w1.shape[1]
    Fp = ((F + 127) // 128) * 128          # lane-dense feature dim
    Kp = ((Kin + 15) // 16) * 16           # bf16 sublane-pack alignment of fc0's K axis

    if tile_n is None:
        # 2-way parallel split over output tiles (feeds both v7x TensorCores); one
        # tile if the feature dim already fits a single 128-lane block.
        tile_n = 128 if Fp > 128 else Fp
    tile_n = min(tile_n, Fp)
    assert Fp % tile_n == 0 and (tile_n == Fp or tile_n % 128 == 0)

    # concat(z, one_hot(y)) built once in the wrapper (bf16, K zero-padded to Kp).
    onehot = jax.nn.one_hot(y.reshape(-1), num_class, dtype=jnp.float32)
    x = _pad_axis(jnp.concatenate([z, onehot], axis=1).astype(jnp.bfloat16), 1, Kp)

    # Padded / packed parameters.  Invariant: bias / gamma / beta / weight padding is
    # zero, so padded feature columns stay exactly 0 through BN, ReLU and fc1.
    w0_p = _pad_axis(_pad_axis(w0, 0, Kp), 1, Fp).astype(jnp.bfloat16)
    w1_p = _pad_axis(_pad_axis(w1, 0, Fp), 1, Fp).astype(jnp.bfloat16)
    bn0_pack = _pad_axis(jnp.concatenate([b0, g0, be0], axis=0), 1, Fp)  # (3, Fp) f32
    bn1_pack = _pad_axis(jnp.concatenate([b1, g1, be1], axis=0), 1, Fp)  # (3, Fp) f32

    grid = (Fp // tile_n,)

    out = pl.pallas_call(
        g_fused_kernel,
        out_shape=jax.ShapeDtypeStruct((B, Fp), jnp.float32),
        grid_spec=pltpu.PrefetchScalarGridSpec(
            num_scalar_prefetch=0,
            grid=grid,
            in_specs=[
                pl.BlockSpec((B, Kp), lambda n: (0, 0)),        # x = [z | one_hot] (resident)
                pl.BlockSpec((Kp, Fp), lambda n: (0, 0)),       # w0, full hidden width (resident)
                pl.BlockSpec((3, Fp), lambda n: (0, 0)),        # [b0; gamma0; beta0] (resident)
                pl.BlockSpec((Fp, tile_n), lambda n: (0, n)),   # w1 output tile
                pl.BlockSpec((3, tile_n), lambda n: (0, n)),    # [b1; gamma1; beta1] tile
            ],
            out_specs=pl.BlockSpec((B, tile_n), lambda n: (0, n)),
        ),
        compiler_params=pltpu.CompilerParams(
            dimension_semantics=("parallel",),
        ),
    )(x, w0_p, bn0_pack, w1_p, bn1_pack)

    return out[:, :F]


def init_params(key, feature_dim, latent_dim, num_class):
    """torch-default init (U(+-1/sqrt(fan_in)) for Linear, gamma=1/beta=0 for BN).
    Weights stored as [in, out] in bf16; biases and BN params as (1, F) f32."""
    in0 = latent_dim + num_class
    k0, k1, k2, k3 = jax.random.split(key, 4)
    bound0 = 1.0 / (in0 ** 0.5)
    bound1 = 1.0 / (feature_dim ** 0.5)
    w0 = jax.random.uniform(k0, (in0, feature_dim), jnp.float32,
                            -bound0, bound0).astype(jnp.bfloat16)
    b0 = jax.random.uniform(k1, (1, feature_dim), jnp.float32, -bound0, bound0)
    w1 = jax.random.uniform(k2, (feature_dim, feature_dim), jnp.float32,
                            -bound1, bound1).astype(jnp.bfloat16)
    b1 = jax.random.uniform(k3, (1, feature_dim), jnp.float32, -bound1, bound1)
    g0 = jnp.ones((1, feature_dim), jnp.float32)
    be0 = jnp.zeros((1, feature_dim), jnp.float32)
    g1 = jnp.ones((1, feature_dim), jnp.float32)
    be1 = jnp.zeros((1, feature_dim), jnp.float32)
    return (w0, b0, g0, be0, w1, b1, g1, be1)


def g_forward_ref(z, y, params, num_class):
    """Pure-JAX f32 reference of the same math (sanity check)."""
    w0, b0, g0, be0, w1, b1, g1, be1 = params
    onehot = jax.nn.one_hot(y.reshape(-1), num_class, dtype=jnp.float32)
    x = jnp.concatenate([z, onehot], axis=1)
    h = x @ w0.astype(jnp.float32) + b0
    m = h.mean(0, keepdims=True)
    v = ((h - m) ** 2).mean(0, keepdims=True)
    h = jnp.maximum(g0 * (h - m) * lax.rsqrt(v + BN_EPS) + be0, 0.0)
    h2 = h @ w1.astype(jnp.float32) + b1
    m2 = h2.mean(0, keepdims=True)
    v2 = ((h2 - m2) ** 2).mean(0, keepdims=True)
    return jnp.maximum(g1 * (h2 - m2) * lax.rsqrt(v2 + BN_EPS) + be1, 0.0)


if __name__ == "__main__":
    feature_dim, latent_dim, num_class = 256, 16, 10
    batch = 8

    key = jax.random.PRNGKey(0)
    kz, ky, kp = jax.random.split(key, 3)
    z = jax.random.normal(kz, (batch, latent_dim), jnp.float32)
    y = jax.random.randint(ky, (batch, 1), 0, num_class, jnp.int32)
    params = init_params(kp, feature_dim, latent_dim, num_class)

    out = g_forward(z, y, params, num_class)
    jax.block_until_ready(out)
    assert out.shape == (batch, feature_dim)

    ref = g_forward_ref(z, y, params, num_class)
    max_err = float(jnp.max(jnp.abs(out - ref)))
    # bf16 matmul inputs (z, hidden activation) vs. the f32 reference -> ~1e-2 tolerance.
    assert max_err < 0.1, f"mismatch vs reference: {max_err}"

    print("KERNEL_OK")
</pallas_src>

<mosaic_0001>
module attributes {stable_mosaic.version = 11 : i64} {
  func.func @g_fused_kernel(%arg0: i32, %arg1: memref<8x32xbf16, #tpu.memory_space<vmem>>, %arg2: memref<32x256xbf16, #tpu.memory_space<vmem>>, %arg3: memref<3x256xf32, #tpu.memory_space<vmem>>, %arg4: memref<256x128xbf16, #tpu.memory_space<vmem>>, %arg5: memref<3x128xf32, #tpu.memory_space<vmem>>, %arg6: memref<8x128xf32, #tpu.memory_space<vmem>>) attributes {dimension_semantics = [#tpu.dimension_semantics<parallel>], iteration_bounds = array<i64: 2>, scalar_prefetch = 0 : i64, scratch_operands = 0 : i64, tpu.core_type = #tpu.core_type<tc>, window_params = [{pipeline_mode = #tpu.pipeline_mode<synchronous>, transform_indices = @transform_0, window_bounds = array<i64: 8, 32>}, {pipeline_mode = #tpu.pipeline_mode<synchronous>, transform_indices = @transform_1, window_bounds = array<i64: 32, 256>}, {pipeline_mode = #tpu.pipeline_mode<synchronous>, transform_indices = @transform_2, window_bounds = array<i64: 3, 256>}, {transform_indices = @transform_3, window_bounds = array<i64: 256, 128>}, {transform_indices = @transform_4, window_bounds = array<i64: 3, 128>}, {transform_indices = @transform_5, window_bounds = array<i64: 8, 128>}]} {
    %c0 = arith.constant 0 : index
    %c0_0 = arith.constant 0 : index
    %0 = vector.load %arg1[%c0, %c0_0] : memref<8x32xbf16, #tpu.memory_space<vmem>>, vector<8x32xbf16>
    %c0_1 = arith.constant 0 : index
    %c0_2 = arith.constant 0 : index
    %1 = vector.load %arg2[%c0_1, %c0_2] : memref<32x256xbf16, #tpu.memory_space<vmem>>, vector<32x256xbf16>
    %cst = arith.constant dense<0.000000e+00> : vector<8x256xf32>
    %2 = tpu.matmul %0, %1, %cst {dimension_numbers = #tpu.dot_dimension_numbers<[1], [0], [0], [1], [0, 0, 1, 1], [], []>} : vector<8x32xbf16>, vector<32x256xbf16>, vector<8x256xf32> -> vector<8x256xf32>
    %c0_3 = arith.constant 0 : index
    %c0_4 = arith.constant 0 : index
    %3 = vector.load %arg3[%c0_3, %c0_4] : memref<3x256xf32, #tpu.memory_space<vmem>>, vector<1x256xf32>
    %4 = vector.broadcast %3 : vector<1x256xf32> to vector<8x256xf32>
    %5 = arith.addf %2, %4 : vector<8x256xf32>
    %cst_5 = arith.constant dense<0.000000e+00> : vector<256xf32>
    %6 = vector.multi_reduction <add>, %5, %cst_5 [0] : vector<8x256xf32> to vector<256xf32>
    %7 = vector.shape_cast %6 : vector<256xf32> to vector<1x256xf32>
    %cst_6 = arith.constant 1.250000e-01 : f32
    %8 = vector.broadcast %cst_6 : f32 to vector<1x256xf32>
    %9 = arith.mulf %7, %8 : vector<1x256xf32>
    %10 = arith.mulf %5, %5 : vector<8x256xf32>
    %cst_7 = arith.constant dense<0.000000e+00> : vector<256xf32>
    %11 = vector.multi_reduction <add>, %10, %cst_7 [0] : vector<8x256xf32> to vector<256xf32>
    %12 = vector.shape_cast %11 : vector<256xf32> to vector<1x256xf32>
    %cst_8 = arith.constant 1.250000e-01 : f32
    %13 = vector.broadcast %cst_8 : f32 to vector<1x256xf32>
    %14 = arith.mulf %12, %13 : vector<1x256xf32>
    %15 = arith.mulf %9, %9 : vector<1x256xf32>
    %16 = arith.subf %14, %15 : vector<1x256xf32>
    %cst_9 = arith.constant 0.000000e+00 : f32
    %17 = vector.broadcast %cst_9 : f32 to vector<1x256xf32>
    %18 = arith.maximumf %16, %17 : vector<1x256xf32>
    %c1 = arith.constant 1 : index
    %c0_10 = arith.constant 0 : index
    %19 = vector.load %arg3[%c1, %c0_10] : memref<3x256xf32, #tpu.memory_space<vmem>>, vector<1x256xf32>
    %20 = vector.broadcast %9 : vector<1x256xf32> to vector<8x256xf32>
    %21 = arith.subf %5, %20 : vector<8x256xf32>
    %22 = vector.broadcast %19 : vector<1x256xf32> to vector<8x256xf32>
    %23 = arith.mulf %22, %21 : vector<8x256xf32>
    %cst_11 = arith.constant 9.99999974E-6 : f32
    %24 = vector.broadcast %cst_11 : f32 to vector<1x256xf32>
    %25 = arith.addf %18, %24 : vector<1x256xf32>
    %26 = math.rsqrt %25 : vector<1x256xf32>
    %27 = vector.broadcast %26 : vector<1x256xf32> to vector<8x256xf32>
    %28 = arith.mulf %23, %27 : vector<8x256xf32>
    %c2 = arith.constant 2 : index
    %c0_12 = arith.constant 0 : index
    %29 = vector.load %arg3[%c2, %c0_12] : memref<3x256xf32, #tpu.memory_space<vmem>>, vector<1x256xf32>
    %30 = vector.broadcast %29 : vector<1x256xf32> to vector<8x256xf32>
    %31 = arith.addf %28, %30 : vector<8x256xf32>
    %cst_13 = arith.constant 0.000000e+00 : f32
    %32 = vector.broadcast %cst_13 : f32 to vector<8x256xf32>
    %33 = arith.maximumf %31, %32 : vector<8x256xf32>
    %34 = arith.truncf %33 : vector<8x256xf32> to vector<8x256xbf16>
    %c0_14 = arith.constant 0 : index
    %c0_15 = arith.constant 0 : index
    %35 = vector.load %arg4[%c0_14, %c0_15] : memref<256x128xbf16, #tpu.memory_space<vmem>>, vector<256x128xbf16>
    %cst_16 = arith.constant dense<0.000000e+00> : vector<8x128xf32>
    %36 = tpu.matmul %34, %35, %cst_16 {dimension_numbers = #tpu.dot_dimension_numbers<[1], [0], [0], [1], [0, 0, 1, 1], [], []>} : vector<8x256xbf16>, vector<256x128xbf16>, vector<8x128xf32> -> vector<8x128xf32>
    %c0_17 = arith.constant 0 : index
    %c0_18 = arith.constant 0 : index
    %37 = vector.load %arg5[%c0_17, %c0_18] : memref<3x128xf32, #tpu.memory_space<vmem>>, vector<1x128xf32>
    %38 = vector.broadcast %37 : vector<1x128xf32> to vector<8x128xf32>
    %39 = arith.addf %36, %38 : vector<8x128xf32>
    %cst_19 = arith.constant dense<0.000000e+00> : vector<128xf32>
    %40 = vector.multi_reduction <add>, %39, %cst_19 [0] : vector<8x128xf32> to vector<128xf32>
    %41 = vector.shape_cast %40 : vector<128xf32> to vector<1x128xf32>
    %cst_20 = arith.constant 1.250000e-01 : f32
    %42 = vector.broadcast %cst_20 : f32 to vector<1x128xf32>
    %43 = arith.mulf %41, %42 : vector<1x128xf32>
    %44 = arith.mulf %39, %39 : vector<8x128xf32>
    %cst_21 = arith.constant dense<0.000000e+00> : vector<128xf32>
    %45 = vector.multi_reduction <add>, %44, %cst_21 [0] : vector<8x128xf32> to vector<128xf32>
    %46 = vector.shape_cast %45 : vector<128xf32> to vector<1x128xf32>
    %cst_22 = arith.constant 1.250000e-01 : f32
    %47 = vector.broadcast %cst_22 : f32 to vector<1x128xf32>
    %48 = arith.mulf %46, %47 : vector<1x128xf32>
    %49 = arith.mulf %43, %43 : vector<1x128xf32>
    %50 = arith.subf %48, %49 : vector<1x128xf32>
    %cst_23 = arith.constant 0.000000e+00 : f32
    %51 = vector.broadcast %cst_23 : f32 to vector<1x128xf32>
    %52 = arith.maximumf %50, %51 : vector<1x128xf32>
    %c1_24 = arith.constant 1 : index
    %c0_25 = arith.constant 0 : index
    %53 = vector.load %arg5[%c1_24, %c0_25] : memref<3x128xf32, #tpu.memory_space<vmem>>, vector<1x128xf32>
    %54 = vector.broadcast %43 : vector<1x128xf32> to vector<8x128xf32>
    %55 = arith.subf %39, %54 : vector<8x128xf32>
    %56 = vector.broadcast %53 : vector<1x128xf32> to vector<8x128xf32>
    %57 = arith.mulf %56, %55 : vector<8x128xf32>
    %cst_26 = arith.constant 9.99999974E-6 : f32
    %58 = vector.broadcast %cst_26 : f32 to vector<1x128xf32>
    %59 = arith.addf %52, %58 : vector<1x128xf32>
    %60 = math.rsqrt %59 : vector<1x128xf32>
    %61 = vector.broadcast %60 : vector<1x128xf32> to vector<8x128xf32>
    %62 = arith.mulf %57, %61 : vector<8x128xf32>
    %c2_27 = arith.constant 2 : index
    %c0_28 = arith.constant 0 : index
    %63 = vector.load %arg5[%c2_27, %c0_28] : memref<3x128xf32, #tpu.memory_space<vmem>>, vector<1x128xf32>
    %64 = vector.broadcast %63 : vector<1x128xf32> to vector<8x128xf32>
    %65 = arith.addf %62, %64 : vector<8x128xf32>
    %cst_29 = arith.constant 0.000000e+00 : f32
    %66 = vector.broadcast %cst_29 : f32 to vector<8x128xf32>
    %67 = arith.maximumf %65, %66 : vector<8x128xf32>
    %c0_30 = arith.constant 0 : index
    %c0_31 = arith.constant 0 : index
    %68 = vector.load %arg6[%c0_30, %c0_31] : memref<8x128xf32, #tpu.memory_space<vmem>>, vector<8x128xf32>
    tpu.vector_store %arg6[%c0_30, %c0_31], %67 {strides = array<i32>} : memref<8x128xf32, #tpu.memory_space<vmem>>, vector<8x128xf32>,
    return
  }
  func.func @transform_0(%arg0: i32) -> (i32, i32) {
    %c0_i32 = arith.constant 0 : i32
    %c0_i32_0 = arith.constant 0 : i32
    %c0_i32_1 = arith.constant 0 : i32
    return %c0_i32, %c0_i32_0 : i32, i32
  }
  func.func @transform_1(%arg0: i32) -> (i32, i32) {
    %c0_i32 = arith.constant 0 : i32
    %c0_i32_0 = arith.constant 0 : i32
    %c0_i32_1 = arith.constant 0 : i32
    return %c0_i32, %c0_i32_0 : i32, i32
  }
  func.func @transform_2(%arg0: i32) -> (i32, i32) {
    %c0_i32 = arith.constant 0 : i32
    %c0_i32_0 = arith.constant 0 : i32
    %c0_i32_1 = arith.constant 0 : i32
    return %c0_i32, %c0_i32_0 : i32, i32
  }
  func.func @transform_3(%arg0: i32) -> (i32, i32) {
    %c0_i32 = arith.constant 0 : i32
    %c0_i32_0 = arith.constant 0 : i32
    return %c0_i32, %arg0 : i32, i32
  }
  func.func @transform_4(%arg0: i32) -> (i32, i32) {
    %c0_i32 = arith.constant 0 : i32
    %c0_i32_0 = arith.constant 0 : i32
    return %c0_i32, %arg0 : i32, i32
  }
  func.func @transform_5(%arg0: i32) -> (i32, i32) {
    %c0_i32 = arith.constant 0 : i32
    %c0_i32_0 = arith.constant 0 : i32
    return %c0_i32, %arg0 : i32, i32
  }
}

</mosaic_0001>

<bundles_post_ra>
// kernel: tpu_custom_call.1
= control target key start
LH: loop header
LB: loop body
LE: loop exit
PB: predicated region body
PF: predicated region fallthrough
CT: control target
= control target key end

     0   :  { %10 = vsyncpa [#allocation3], 0  ;;  %s1489_s0 = inlined_call_operand.hbm [shape: bf16[8,32], index: 0, kind: input, shape index: {}]   ;;  %s1490_s1 = inlined_call_operand.hbm [shape: bf16[32,256], index: 1, kind: input, shape index: {}]   ;;  %s1491_s2 = inlined_call_operand.hbm [shape: f32[3,256], index: 2, kind: input, shape index: {}]   ;;  %s1492_s3 = inlined_call_operand.hbm [shape: bf16[256,256], index: 3, kind: input, shape index: {}]   ;;  %s1493_s4 = inlined_call_operand.vmem [shape: f32[3,256], index: 4, kind: input, shape index: {}]   ;;  %s1494_s5 = inlined_call_operand.hbm [shape: f32[8,256], index: 5, kind: output, shape index: {}]  }
   0x1   :  { %11 = vsyncpa [#allocation6], 0 }
   0x2   :  { %12 = vsyncpa [#allocation9], 0 }
   0x3   :  { %14 = vsyncpa [#allocation9 + $0x1], 0 }
   0x4   :  { %15 = vsyncpa [#allocation4], 0 }
   0x5   :  { %17 = vsyncpa [#allocation4 + $0x1], 0  ;;  %s1201_s18 = smov 0   ;;  %s1203_s19 = smov 0  }
   0x6   :  { %s1205_s20 = smov 0   ;;  %s1207_s21 = smov 0  }
   0x7 LB: > { %s1222_s22 = sadd.s32 4294967295, %s1159_s21   ;;  %s796_s23 = sadd.s32 4294967294, %s1159_s21   ;;  %s1159_s21 = sphi %s1207_s21, %s1527_s21   ;;  %s1155_s20 = sphi %s1205_s20, %s1526_s20   ;;  %s1151_s19 = sphi %s1203_s19, %s1525_s19   ;;  %s1147_s18 = sphi %s1201_s18, %s1524_s18  }
   0x8   : > { %s1226_s24 = sadd.s32 1, %s1159_s21   ;;  %s93_s25 = sadd.s32 1, %s1155_s20 }
   0x9   : > { %s90_s26 = ssub.s32 %s1159_s21, %s1226_s24  ;;  %p100_p0 = scmp.ne.s32.totalorder %s1155_s20, %s1151_s19 }
   0xa   : > { %p91_p1 = scmp.eq.s32.totalorder %s90_s26, 0  ;;  %p101_p2 = scmp.eq.s32.totalorder %s1159_s21, 0 }
   0xb   : > { %p106_p3 = scmp.ne.s32.totalorder %s1151_s19, %s1147_s18  ;;  %p1495_p4 = scmp.eq.s32.totalorder %s1222_s22, 0 }
   0xc   : > { %s1238_s27 = scalar_select %p91_p1, %s1155_s20, %s93_s25  }
   0xd   : > { %p1240_p5 = por %p101_p2, %p100_p0  ;;  %p1246_p6 = por %p1495_p4, %p106_p3 }
   0xe   : > { %1501 = sst [smem:[#allocation15_spill]] %s1238_s27  ;;  %p156_p7 = scmp.eq.s32.totalorder %s1222_s22, 1 }
   0xf   : > { %s1502_s28 = scalar_select %p1240_p5, 1, 0 }
  0x10   : > { %s1503_s29 = scalar_select %p1246_p6, 1, 0 }
  0x11   : > { %p162_p8 = scmp.eq.s32.totalorder %s796_s23, 1  ;;  %p797_p9 = scmp.ge.s32.totalorder %s1159_s21, 1 }
  0x12   : > { %p169_p10 = scmp.lt.s32.totalorder %s1159_s21, 3  ;;  %p1253_p11 = por %p156_p7, %p100_p0 }
  0x13   : > { %p1257_p12 = por %p162_p8, %p106_p3  ;;  %s1161_s8 = smov [#allocation5]  }
  0x14   : > { %s1504_s30 = scalar_select %p1253_p11, 1, 0 }
  0x15   : > { %s1505_s6 = scalar_select %p1257_p12, 1, 0 }
  0x16   : > { %p1261_p13 = pnand %p797_p9, %p169_p10  ;;  %s192_s9 = sshll.u32 %s1161_s8, 4  ;;  %s193_s9 = int_to_ptr.vmem [resolvable:$true] %s192_s9 }
  0x17   : > { %s1162_s11 = smov [#allocation2]   ;;  %s971_s15 = scalar_lea.hbm %s1490_s1, 512 }
  0x18   : > { %s1506_s7 = scalar_select %p1261_p13, 1, 0 }
  0x19   : > { %p877_p1 = pneg %p1261_p13  ;;  %s182_s12 = sshll.u32 %s1162_s11, 4  ;;  %s183_s12 = int_to_ptr.vmem [resolvable:$true] %s182_s12 }
  0x1a   : > { %p972_p7 = scmp.ne.s32.totalorder %s1490_s1, %s971_s15 }
  0x1b   : > { %p1269_p2 = pnand %p877_p1, %p1495_p4  ;;  %p978_p1 = scmp.lt.u32.totalorder %s971_s15, %s1490_s1 }
  0x1d   : > { %p1283_p8 = pneg %p1269_p2 }
  0x1f   : > { %p974_p9 = pnand %p1283_p8, %p972_p7 }
  0x21   : > { %p975_p10 = pneg %p974_p9 }
  0x23   : > { %p980_p0 = pnand %p978_p1, %p975_p10 }
  0x25   : > { %983 = shalt.err (!%p980_p0)
}
  0x26   : > { %s984_s8 = scalar_lea.vmem %s193_s9, 512  ;;  %p992_p11 = scmp.lt.s32.totalorder %s193_s9, %s193_s9 }
  0x27   : > { %p985_p4 = scmp.ne.s32.totalorder %s193_s9, %s984_s8  ;;  %p993_p6 = scmp.lt.s32.totalorder %s984_s8, %s984_s8 }
  0x29   : > { %p987_p3 = pnand %p985_p4, %p1283_p8  ;;  %p994_p13 = por %p993_p6, %p992_p11 }
  0x2b   : > { %p988_p12 = pneg %p987_p3 }
  0x2d   : > { %p995_p5 = pnand %p994_p13, %p988_p12 }
  0x2f   : > { %998 = shalt.err (!%p995_p5)
}
  0x30   : > { %s1500_s11 = smov 128   ;;  %s1164_s13 = smov 8  }
  0x31   : > { %883 = dma.hbm_to_vmem [thread:$0]  (!%p1269_p2), %s1490_s1, 512, %s193_s9, [#allocation6], %s1500_s11, %s1500_s11, %s1164_s13  }
  0x32   : > { %p1509_p4 = scmp.ne.s32.totalorder %s1502_s28, 0  ;;  %p1510_p0 = scmp.lt.s32.totalorder %s1159_s21, 2 }
  0x33   : > { %s999_s26 = scalar_lea.hbm %s1489_s0, 64 }
  0x34   : > { %p1305_p3 = pnand %p1510_p0, %p1509_p4  ;;  %p1000_p5 = scmp.ne.s32.totalorder %s1489_s0, %s999_s26 }
  0x35   : > { %p1006_p12 = scmp.lt.u32.totalorder %s999_s26, %s1489_s0 }
  0x36   : > { %s1511_s16 = scalar_select %p1305_p3, 1, 0 }
  0x37   : > { %p1002_p6 = pnand %p1000_p5, %p1283_p8 }
  0x39   : > { %p1003_p11 = pneg %p1002_p6 }
  0x3b   : > { %p1008_p13 = pnand %p1006_p12, %p1003_p11 }
  0x3d   : > { %1011 = shalt.err (!%p1008_p13)
}
  0x3e   : > { %s1012_s28 = scalar_lea.vmem %s183_s12, 64  ;;  %p1020_p1 = scmp.lt.s32.totalorder %s183_s12, %s183_s12 }
  0x3f   : > { %p1013_p7 = scmp.ne.s32.totalorder %s183_s12, %s1012_s28  ;;  %p1021_p4 = scmp.lt.s32.totalorder %s1012_s28, %s1012_s28 }
  0x41   : > { %p1015_p9 = pnand %p1013_p7, %p1283_p8  ;;  %p1022_p0 = por %p1021_p4, %p1020_p1 }
  0x43   : > { %p1016_p10 = pneg %p1015_p9 }
  0x45   : > { %p1023_p3 = pnand %p1022_p0, %p1016_p10 }
  0x47   : > { %1026 = shalt.err (!%p1023_p3)
}
  0x48   : > { %880 = dma.hbm_to_vmem [thread:$0]  (!%p1269_p2), %s1489_s0, 64, %s183_s12, [#allocation3]  }
  0x49   : > { %s1165_s15 = smov [#allocation7]   ;;  %s217_s25 = sand.u32 1, %s1155_s20  }
  0x4a   : > { %s206_s17 = sshll.u32 %s1165_s15, 4  ;;  %s1027_s14 = scalar_lea.hbm %s1491_s2, 128  ;;  %s207_s17 = int_to_ptr.vmem [resolvable:$true] %s206_s17 }
  0x4b   : > { %p1028_p3 = scmp.ne.s32.totalorder %s1491_s2, %s1027_s14  ;;  %p1034_p11 = scmp.lt.u32.totalorder %s1027_s14, %s1491_s2 }
  0x4d   : > { %p1030_p5 = pnand %p1028_p3, %p1283_p8 }
  0x4f   : > { %p1031_p6 = pneg %p1030_p5 }
  0x51   : > { %p1036_p12 = pnand %p1034_p11, %p1031_p6 }
  0x53   : > { %1039 = shalt.err (!%p1036_p12)
}
  0x54   : > { %s1040_s12 = scalar_lea.vmem %s207_s17, 128  ;;  %p1048_p10 = scmp.lt.s32.totalorder %s207_s17, %s207_s17 }
  0x55   : > { %p1041_p13 = scmp.ne.s32.totalorder %s207_s17, %s1040_s12  ;;  %p1049_p1 = scmp.lt.s32.totalorder %s1040_s12, %s1040_s12 }
  0x57   : > { %p1043_p7 = pnand %p1041_p13, %p1283_p8  ;;  %p1050_p4 = por %p1049_p1, %p1048_p10 }
  0x59   : > { %p1044_p9 = pneg %p1043_p7 }
  0x5b   : > { %p1051_p0 = pnand %p1050_p4, %p1044_p9 }
  0x5d   : > { %1054 = shalt.err (!%p1051_p0)
}
  0x5e   : > { %886 = dma.hbm_to_vmem [thread:$0]  (!%p1269_p2), %s1491_s2, 128, %s207_s17, [#allocation6]  }
  0x5f   : > { %s802_s11 = sshll.u32 %s217_s25, 7  ;;  %s803_s26 = sshll.u32 %s1159_s21, 6 }
  0x60   : > { %s1350_s14 = scalar_lea.hbm %s1492_s3, %s803_s26  ;;  %s221_s9 = scalar_lea.vmem [#allocation8], %s802_s11 }
  0x61   : > { %s227_s10 = sshll.u32 %s221_s9, 4  ;;  %s1354_s28 = scalar_lea.sflag [#allocation9], %s217_s25  ;;  %s1352_s10 = int_to_ptr.vmem [resolvable:$true] %s227_s10 }
  0x62   : > { %s1055_s27 = scalar_lea.hbm %s1350_s14, 2048  ;;  %p1512_p2 = scmp.ne.s32.totalorder %s1511_s16, 0 }
  0x63   : > { %p1056_p8 = scmp.ne.s32.totalorder %s1350_s14, %s1055_s27  ;;  %s1060_s13 = scalar_lea.hbm %s1492_s3, 4096 }
  0x64   : > { %p1057_p3 = pneg %p1512_p2  ;;  %p1061_p11 = scmp.lt.u32.totalorder %s1350_s14, %s1492_s3 }
  0x65   : > { %p1062_p12 = scmp.lt.u32.totalorder %s1060_s13, %s1055_s27  ;;  %p1064_p7 = scmp.lt.u32.totalorder %s1055_s27, %s1350_s14 }
  0x66   : > { %p1058_p5 = pnand %p1057_p3, %p1056_p8 }
  0x67   : > { %p1063_p13 = por %p1062_p12, %p1061_p11 }
  0x68   : > { %p1059_p6 = pneg %p1058_p5 }
  0x69   : > { %p1065_p9 = por %p1064_p7, %p1063_p13 }
  0x6b   : > { %p1066_p10 = pnand %p1065_p9, %p1059_p6 }
  0x6d   : > { %1069 = shalt.err (!%p1066_p10)
}
  0x6e   : > { %s1070_s25 = scalar_lea.vmem %s1352_s10, 2048  ;;  %s1166_s11 = smov [#allocation8]  }
  0x6f   : > { %p1071_p1 = scmp.ne.s32.totalorder %s1352_s10, %s1070_s25  ;;  %s1075_s8 = sshll.u32 %s1166_s11, 4  ;;  %s1076_s8 = int_to_ptr.vmem [resolvable:$false] %s1075_s8 }
  0x70   : > { %s1077_s23 = scalar_lea.vmem %s1076_s8, 4096  ;;  %p1078_p8 = scmp.lt.s32.totalorder %s1352_s10, %s1076_s8 }
  0x71   : > { %p1073_p4 = pnand %p1071_p1, %p1057_p3  ;;  %p1079_p5 = scmp.lt.s32.totalorder %s1077_s23, %s1070_s25 }
  0x73   : > { %p1074_p0 = pneg %p1073_p4  ;;  %p1080_p11 = por %p1079_p5, %p1078_p8 }
  0x75   : > { %p1081_p12 = pnand %p1080_p11, %p1074_p0 }
  0x77   : > { %1084 = shalt.err (!%p1081_p12)
}
  0x78   : > { %s1167_s9 = smov 64   ;;  %s1168_s27 = smov 4  }
  0x79   : > { %s1513_s17 = smov 128   ;;  %p1514_p3 = scmp.ne.s32.totalorder %s1506_s7, 0 }
  0x7a   : > { %890 = dma.hbm_to_vmem [thread:$0]  (!%p1512_p2), %s1350_s14, 2048, %s1352_s10, %s1354_s28, %s1513_s17, %s1167_s9, %s1168_s27  }
  0x7b   : > { %246 = sbr.rel (%p1514_p3) target bundleno = 674 (0x2a2), region = 40  ;;  %p1515_p6 = scmp.eq.s32.totalorder (!%p1514_p3), %s1222_s22, 0 }
  0x82   : > { %1130 = dma.done.wait (%p1515_p6), [#allocation3], 64   ;;  %p1516_p13 = pmov %p1515_p6 }
  0x83   : > { %p1517_p7 = pmov %p1515_p6 }
  0x84   : > { %1132 = vsyncadd (%p1516_p13), [#allocation3], 4294967232 }
  0x85   : > { %1134 = dma.done.wait (%p1517_p7), [#allocation6], 640   ;;  %p1518_p9 = pmov %p1515_p6 }
  0x86   : > { %s1394_s16 = sand.u32 1, %s1151_s19   ;;  %p1519_p2 = scmp.ne.s32.totalorder %s1503_s29, 0 }
  0x87   : > { %1136 = vsyncadd (%p1518_p9), [#allocation6], 4294966656  ;;  %s808_s7 = sshll.u32 %s1394_s16, 7  ;;  %s261_s14 = scalar_lea.sflag [#allocation9], %s1394_s16 }
  0x88   : > { %s1398_s10 = scalar_lea.vmem [#allocation8], %s808_s7 }
  0x89   : > { %1138 = dma.done.wait (%p1519_p2), %s261_s14, 2048  }
  0x8a   : > { %1140 = vsyncadd (%p1519_p2), %s261_s14, 4294965248  ;;  %v1169_v0 = vmov 0   ;;  %v943_v1 = vld [vmem:[#allocation5 + $0x4] ss:$8 sps:$4 sm:$0xff]   ;;  %v945_v2 = vld [vmem:[#allocation5] ss:$8 sps:$4 sm:$0xff]   ;;  %v307_v22 = vlaneseq }
  0x8b   : > { %373 = vmatprep.mubr.bf16.mxu0 %v1169_v0  ;;  %341 = vmatprep.subr.bf16.mxu0 %v943_v1  ;;  %v946_v3 = vld [vmem:[#allocation5 + $0x14] ss:$8 sps:$4 sm:$0xff]   ;;  %v948_v4 = vld [vmem:[#allocation5 + $0x10] ss:$8 sps:$4 sm:$0xff]   ;;  %vm337_vm0 = vcmask 261120   ;;  %v949_v6 = vld [vmem:[%s1398_s10 + $0x40] sm:$0xff]  }
  0x8c   : > { %342 = vmatpush1.bf16.msra.mxu0 %v945_v2  ;;  %v300_v5 = vld [vmem:[#allocation2] sm:$0xf]  ;;  %v950_v7 = vld [vmem:[%s1398_s10] sm:$0xff]   ;;  %839 = vmatprep.subr.bf16.mxu1 %v949_v6  ;;  %v951_v8 = vld [vmem:[%s1398_s10 + $0x48] sm:$0xff]   ;;  %v308_v23 = vshrl.u32 %v307_v22, 7  ;;  %p295_p10 = scmp.lt.s32.totalorder %s1222_s22, 1 }
  0x8d   : > { %343 = vmatprep.subr.bf16.mxu0 %v946_v3  ;;  %840 = vmatpush3.bf16.msra.mxu1 %v950_v7  ;;  %v952_v9 = vld [vmem:[%s1398_s10 + $0x8] sm:$0xff]   ;;  %v953_v10 = vld [vmem:[%s1398_s10 + $0x50] sm:$0xff]   ;;  %v955_v12 = vld [vmem:[%s1398_s10 + $0x58] sm:$0xff]   ;;  %s809_s26 = sshll.u32 %s1394_s16, 3  ;;  %s836_s25 = sshll.u32 %s1222_s22, 7 }
  0x8e   : > { %841 = vmatprep.subr.bf16.mxu1 %v951_v8  ;;  %v954_v11 = vld [vmem:[%s1398_s10 + $0x10] sm:$0xff]   ;;  %v956_v13 = vld [vmem:[%s1398_s10 + $0x18] sm:$0xff]   ;;  %v957_v14 = vld [vmem:[%s1398_s10 + $0x60] sm:$0xff]   ;;  %v1420_v24 = vsub.s32 0, %v308_v23  ;;  %v1422_v26 = vsub.s32 1, %v308_v23  ;;  %s296_s29 = scalar_select %p295_p10, %s1222_s22, 1 }
  0x8f   : > { %v958_v15 = vld [vmem:[%s1398_s10 + $0x20] sm:$0xff]   ;;  %v959_v16 = vld [vmem:[%s1398_s10 + $0x68] sm:$0xff]   ;;  %v961_v18 = vld [vmem:[%s1398_s10 + $0x70] sm:$0xff]   ;;  %s294_s11 = scalar_lea.vmem [#allocation10], %s809_s26  ;;  %s1445_s27 = scalar_lea.hbm %s1494_s5, %s836_s25 }
  0x90   : > { %344 = vmatpush1.bf16.msra.mxu0 %v948_v4  ;;  %v960_v17 = vld [vmem:[%s1398_s10 + $0x28] sm:$0xff]   ;;  %v962_v19 = vld [vmem:[%s1398_s10 + $0x30] sm:$0xff]   ;;  %v963_v20 = vld [vmem:[%s1398_s10 + $0x78] sm:$0xff]   ;;  %s810_s28 = sshll.u32 %s296_s29, 2  ;;  %s683_s8 = sshll.u32 %s294_s11, 4  ;;  %s1447_s8 = int_to_ptr.vmem [resolvable:$true] %s683_s8 }
  0x91   : > { %842 = vmatpush3.bf16.msra.mxu1 %v952_v9  ;;  %v964_v21 = vld [vmem:[%s1398_s10 + $0x38] sm:$0xff]   ;;  %s1435_s15 = scalar_lea.vmem %s1493_s4, %s810_s28  ;;  %s670_s17 = scalar_lea.sflag [#allocation4], %s1394_s16 }
  0x92   : > { %843 = vmatprep.subr.bf16.mxu1 %v953_v10  ;;  %v305_v25 = vld [vmem:[#allocation7] ss:$4 sm:$0x3]  ;;  %v419_v9 = vld [vmem:[#allocation7 + $0x1] ss:$4 sm:$0x3] }
  0x93   : > { %815 = vmatmul.mubr.msk.bf16.vlgmr.msra.gmra.mrb[0].mxu0 %vm337_vm0, %v300_v5  ;;  %v310_v27 = vrot.slane %v305_v25, %v1420_v24  ;;  %v314_v28 = vrot.slane %v305_v25, %v1422_v26  ;;  %s1085_s7 = scalar_lea.vmem %s1447_s8, 128  ;;  %p1520_p4 = scmp.ne.s32.totalorder %s1504_s30, 0 }
  0x94   : > { %p1086_p1 = scmp.ne.s32.totalorder %s1447_s8, %s1085_s7  ;;  %s1170_s22 = smov [#allocation10]  }
  0x95   : > { %844 = vmatpush3.bf16.msra.mxu1 %v954_v11  ;;  %v426_v11 = vrot.slane %v419_v9, %v1420_v24  ;;  %s1089_s14 = sshll.u32 %s1170_s22, 4  ;;  %s1090_s14 = int_to_ptr.vmem [resolvable:$false] %s1089_s14 }
  0x96   : > { %845 = vmatprep.subr.bf16.mxu1 %v955_v12  ;;  %p1087_p0 = pnand %p1086_p1, %p1520_p4  ;;  %s1091_s10 = scalar_lea.vmem %s1090_s14, 256 }
  0x97   : > { %p1092_p5 = scmp.lt.s32.totalorder %s1447_s8, %s1090_s14  ;;  %p1093_p11 = scmp.lt.s32.totalorder %s1091_s10, %s1085_s7 }
  0x98   : > { %p1088_p8 = pneg %p1087_p0 }
  0x99   : > { %846 = vmatpush3.bf16.msra.mxu1 %v956_v13  ;;  %v430_v13 = vrot.slane %v419_v9, %v1422_v26  ;;  %p1094_p12 = por %p1093_p11, %p1092_p5 }
  0x9a   : > { %847 = vmatprep.subr.bf16.mxu1 %v957_v14  ;;  %v442_v14 = vld [vmem:[#allocation7 + $0x2] ss:$4 sm:$0x3] }
  0x9b   : > { %p1095_p3 = pnand %p1094_p12, %p1088_p8 }
  0x9d   : > { %848 = vmatpush3.bf16.msra.mxu1 %v958_v15  ;;  %v447_v15 = vrot.slane %v442_v14, %v1420_v24 }
  0x9e   : > { %849 = vmatprep.subr.bf16.mxu1 %v959_v16 }
  0xa1   : > { %850 = vmatpush3.bf16.msra.mxu1 %v960_v17 }
  0xa2   : > { %851 = vmatprep.subr.bf16.mxu1 %v961_v18 }
  0xa5   : > { %852 = vmatpush3.bf16.msra.mxu1 %v962_v19  ;;  %v451_v19 = vrot.slane %v442_v14, %v1422_v26  ;;  %v816_v26 = vld [vmem:[%s1435_s15] ss:$0 sm:$0xff] }
  0xa6   : > { %853 = vmatprep.subr.bf16.mxu1 %v963_v20 }
  0xa9   : > { %854 = vmatpush3.bf16.msra.mxu1 %v964_v21 }
 0x166   : > { %v375_v29 = vpop.f32.mrb[0].mxu0 }
 0x167   : > { %v376_v30 = vadd.f32 %v375_v29, %v310_v27  ;;  %v377_v31 = vpop.f32.mrb[1].mxu0 }
 0x168   : > { %v378_v32 = vadd.f32 %v377_v31, %v314_v28  ;;  %v379_v33 = vpop.f32.mrb[2].mxu0 }
 0x169   : > { %v382_v34 = vrot.slane %v376_v30, 4  ;;  %v396_v35 = vmul.f32 %v376_v30, %v376_v30  ;;  %v380_v36 = vpop.f32.mrb[3].mxu0 }
 0x16a   : > { %v388_v37 = vrot.slane %v378_v32, 4  ;;  %v397_v38 = vmul.f32 %v378_v32, %v378_v32 }
 0x16b   : > { %v383_v39 = vadd.f32 %v382_v34, %v376_v30  ;;  %v398_v40 = vrot.slane %v396_v35, 4 }
 0x16c   : > { %v389_v41 = vadd.f32 %v388_v37, %v378_v32  ;;  %v404_v42 = vrot.slane %v397_v38, 4 }
 0x16d   : > { %v384_v43 = vrot.slane %v383_v39, 2  ;;  %v399_v44 = vadd.f32 %v398_v40, %v396_v35 }
 0x16e   : > { %v390_v45 = vrot.slane %v389_v41, 2  ;;  %v405_v46 = vadd.f32 %v404_v42, %v397_v38 }
 0x16f   : > { %v385_v47 = vadd.f32 %v384_v43, %v383_v39  ;;  %v400_v48 = vrot.slane %v399_v44, 2 }
 0x170   : > { %v391_v49 = vadd.f32 %v390_v45, %v389_v41  ;;  %v406_v50 = vrot.slane %v405_v46, 2 }
 0x171   : > { %v386_v51 = vrot.slane %v385_v47, 1  ;;  %v401_v52 = vadd.f32 %v400_v48, %v399_v44 }
 0x172   : > { %v407_v53 = vadd.f32 %v406_v50, %v405_v46  ;;  %v392_v54 = vrot.slane %v391_v49, 1 }
 0x173   : > { %v387_v55 = vadd.f32 %v386_v51, %v385_v47  ;;  %v402_v56 = vrot.slane %v401_v52, 1 }
 0x174   : > { %v408_v57 = vrot.slane %v407_v53, 1  ;;  %v393_v58 = vadd.f32 %v392_v54, %v391_v49 }
 0x175   : > { %v394_v59 = vmul.f32 0.125, %v387_v55  ;;  %v403_v60 = vadd.f32 %v402_v56, %v401_v52  ;;  %v833_v56 = vld [vmem:[%s1435_s15 + $0x1] ss:$0 sm:$0xff] }
 0x176   : > { %v409_v61 = vadd.f32 %v408_v57, %v407_v53  ;;  %v395_v62 = vmul.f32 0.125, %v393_v58 }
 0x177   : > { %v410_v63 = vmul.f32 0.125, %v403_v60  ;;  %v412_v0 = vmul.f32 %v394_v59, %v394_v59  ;;  %v420_v10 = vsub.f32 %v376_v30, %v394_v59  ;;  %v834_v59 = vld [vmem:[%s1435_s15 + $0x2] ss:$0 sm:$0xff] }
 0x178   : > { %v411_v1 = vmul.f32 0.125, %v409_v61  ;;  %v413_v2 = vmul.f32 %v395_v62, %v395_v62  ;;  %v421_v12 = vsub.f32 %v378_v32, %v395_v62 }
 0x179   : > { %v414_v3 = vsub.f32 %v410_v63, %v412_v0  ;;  %v433_v16 = vmul.f32 %v426_v11, %v420_v10 }
 0x17a   : > { %v415_v4 = vsub.f32 %v411_v1, %v413_v2  ;;  %v434_v18 = vmul.f32 %v430_v13, %v421_v12 }
 0x17b   : > { %v416_v5 = vmax.f32 %v414_v3, 0.0 }
 0x17c   : > { %v417_v6 = vmax.f32 %v415_v4, 0.0 }
 0x17d   : > { %v435_v7 = vadd.f32 1e-05, %v416_v5 }
 0x17e   : > { %v436_v8 = vadd.f32 1e-05, %v417_v6 }
 0x17f   : > { %965 = vrsqrt.f32 %v435_v7 }
 0x180   : > { %967 = vrsqrt.f32 %v436_v8 }
 0x189   : > { %v966_v17 = vpop.eup %965 }
 0x18a   : > { %v968_v20 = vpop.eup %967  ;;  %v439_v21 = vmul.f32 %v966_v17, %v433_v16 }
 0x18b   : > { %v440_v22 = vmul.f32 %v968_v20, %v434_v18 }
 0x18c   : > { %v454_v23 = vadd.f32 %v447_v15, %v439_v21 }
 0x18d   : > { %v455_v25 = vadd.f32 %v451_v19, %v440_v22 }
 0x18e   : > { %v456_v27 = vmax.f32 %v454_v23, 0.0 }
 0x18f   : > { %v457_v28 = vmax.f32 %v455_v25, 0.0 }
 0x190   : > { %v458_v30 = vpack.c.bf16 %v456_v27, %v456_v27 }
 0x191   : > { %v459_v29 = vpack.c.bf16 %v457_v28, %v457_v28 }
 0x193   : > { %625 = vmatprep.mubr.bf16.mxu1 %v459_v29 }
 0x194   : > { %626 = vmatmul.mubr.bf16.vlgmr.msra.gmra.mrb[0].mxu1 %v458_v30 }
 0x267   : > { %v855_v24 = vpop.f32.mrb[0].mxu1 }
 0x268   : > { %v856_v31 = vpop.f32.mrb[1].mxu1 }
 0x269   : > { %v857_v32 = vadd.f32 %v856_v31, %v855_v24  ;;  %v858_v33 = vpop.f32.mrb[2].mxu1 }
 0x26a   : > { %v859_v34 = vpop.f32.mrb[3].mxu1 }
 0x26b   : > { %v628_v35 = vadd.f32 %v857_v32, %v816_v26 }
 0x26d   : > { %v633_v36 = vrot.slane %v628_v35, 4  ;;  %v640_v37 = vmul.f32 %v628_v35, %v628_v35 }
 0x26f   : > { %v634_v38 = vadd.f32 %v633_v36, %v628_v35  ;;  %v641_v39 = vrot.slane %v640_v37, 4 }
 0x271   : > { %v635_v40 = vrot.slane %v634_v38, 2  ;;  %v642_v41 = vadd.f32 %v641_v39, %v640_v37 }
 0x273   : > { %v636_v42 = vadd.f32 %v635_v40, %v634_v38  ;;  %v643_v43 = vrot.slane %v642_v41, 2 }
 0x275   : > { %v637_v44 = vrot.slane %v636_v42, 1  ;;  %v644_v45 = vadd.f32 %v643_v43, %v642_v41 }
 0x277   : > { %v638_v46 = vadd.f32 %v637_v44, %v636_v42  ;;  %v645_v47 = vrot.slane %v644_v45, 1 }
 0x279   : > { %v639_v48 = vmul.f32 0.125, %v638_v46  ;;  %v646_v49 = vadd.f32 %v645_v47, %v644_v45 }
 0x27b   : > { %v647_v50 = vmul.f32 0.125, %v646_v49  ;;  %v648_v51 = vmul.f32 %v639_v48, %v639_v48  ;;  %v652_v55 = vsub.f32 %v628_v35, %v639_v48 }
 0x27d   : > { %v649_v52 = vsub.f32 %v647_v50, %v648_v51  ;;  %v657_v57 = vmul.f32 %v833_v56, %v652_v55 }
 0x27f   : > { %v650_v53 = vmax.f32 %v649_v52, 0.0 }
 0x281   : > { %v658_v54 = vadd.f32 1e-05, %v650_v53 }
 0x283   : > { %969 = vrsqrt.f32 %v658_v54 }
 0x28d   : > { %v970_v58 = vpop.eup %969 }
 0x28e   : > { %v660_v60 = vmul.f32 %v970_v58, %v657_v57 }
 0x290   : > { %v666_v61 = vadd.f32 %v834_v59, %v660_v60 }
 0x292   : > { %v667_v62 = vmax.f32 %v666_v61, 0.0 }
 0x294   : > { %668 = vst [vmem:[%s294_s11] sm:$0xff] %v667_v62 }
 0x295   : > { %1098 = shalt.err (!%p1095_p3)
}
 0x296   : > { %s1099_s16 = scalar_lea.hbm %s1445_s27, 128  ;;  %s1103_s12 = scalar_lea.hbm %s1494_s5, 256 }
 0x297   : > { %p1100_p6 = scmp.ne.s32.totalorder %s1445_s27, %s1099_s16  ;;  %p1104_p9 = scmp.lt.u32.totalorder %s1445_s27, %s1494_s5 }
 0x298   : > { %p1105_p2 = scmp.lt.u32.totalorder %s1103_s12, %s1099_s16  ;;  %p1107_p1 = scmp.lt.u32.totalorder %s1099_s16, %s1445_s27 }
 0x299   : > { %p1101_p13 = pnand %p1100_p6, %p1520_p4 }
 0x29a   : > { %p1106_p10 = por %p1105_p2, %p1104_p9 }
 0x29b   : > { %p1102_p7 = pneg %p1101_p13 }
 0x29c   : > { %p1108_p0 = por %p1107_p1, %p1106_p10 }
 0x29e   : > { %p1109_p8 = pnand %p1108_p0, %p1102_p7 }
 0x2a0   : > { %1112 = shalt.err (!%p1109_p8)
}
 0x2a1   : > { %875 = dma.vmem_to_hbm [thread:$0]  (%p1520_p4), %s1447_s8, 128, %s1445_s27, %s670_s17  }
 0x2a2 PF: > { %s695_s26 = sand.u32 1, %s1147_s18   ;;  %p1521_p5 = scmp.ne.s32.totalorder %s1505_s6, 0 }
 0x2a3   : > { %p1522_p11 = scmp.ge.s32.totalorder %s1159_s21, 2  ;;  %s696_s25 = scalar_lea.sflag [#allocation4], %s695_s26 }
 0x2a5   : > { %p892_p12 = pnand %p1522_p11, %p1521_p5 }
 0x2a7   : > { %1142 = dma.done.wait (!%p892_p12), %s696_s25, 128  }
 0x2a8   : > { %1144 = vsyncadd (!%p892_p12), %s696_s25, 4294967168  ;;  %s1523_s11 = sld [smem:[#allocation15_spill]]  ;;  %p20_p3 = scmp.ge.s32.totalorder %s1226_s24, 4  }
 0x2a9   : > { %s1524_s18 = smov %s1151_s19  ;;  %s1525_s19 = smov %s1155_s20 }
 0x2aa   : > { %s1527_s21 = smov %s1226_s24  ;;  %22 = sbr.rel (!%p20_p3) target bundleno = 7 (0x7), region = 103 }
 0x2ae   : > { %s1526_s20 = smov %s1523_s11 }
 0x2b1   :  { %701 = vsyncpa [#allocation3], 1 }
 0x2b2   :  { %703 = vsyncpa [#allocation3 + $0x1], 1 }
 0x2b3   :  { %704 = vsyncpa [#allocation6], 1 }
 0x2b4   :  { %705 = vsyncpa [#allocation9], 1 }
 0x2b5   :  { %707 = vsyncpa [#allocation9 + $0x1], 1 }
 0x2b6   :  { %708 = vsyncpa [#allocation4], 1 }
 0x2b7   :  { %710 = vsyncpa [#allocation4 + $0x1], 1 }

</bundles_post_ra>
